<compile_context>
chip_gen: v6e
topology: v6e:2x2x1
jax: 0.10.0
libtpu: 0.0.40
codegen_flags: <defaults>
</compile_context>

<pallas_src>
import jax
import jax.numpy as jnp
from jax.experimental import pallas as pl
from jax.experimental.pallas import tpu as pltpu


def _neg_square_kernel(x_ref, o_ref):
    # Scalar path: one SMEM load, one multiply, one negate, one SMEM store —
    # all on the scalar ALU. No vector units, no DMA pipelining.
    v = x_ref[0]
    o_ref[0] = -(v * v)


def _neg_square_pallas(x_param: jax.Array) -> jax.Array:
    """x_param: shape (1,), float32. Returns -x**2 with shape (1,)."""
    return pl.pallas_call(
        _neg_square_kernel,
        out_shape=jax.ShapeDtypeStruct((1,), jnp.float32),
        in_specs=[pl.BlockSpec(memory_space=pltpu.SMEM)],
        out_specs=pl.BlockSpec(memory_space=pltpu.SMEM),
        cost_estimate=pl.CostEstimate(
            flops=2, transcendentals=0, bytes_accessed=8
        ),
    )(x_param)


# ---- differentiable wrapper (pallas_call has no autodiff rule) -------------
@jax.custom_vjp
def quadratic_forward(x_param: jax.Array) -> jax.Array:
    return _neg_square_pallas(x_param)


def _quadratic_fwd(x_param):
    return _neg_square_pallas(x_param), x_param


def _quadratic_bwd(x_param, g):
    # d/dx (-x^2) = -2x
    return (-2.0 * x_param * g,)


quadratic_forward.defvjp(_quadratic_fwd, _quadratic_bwd)


if __name__ == "__main__":
    # Parameter initialized deterministically, exactly as in the PyTorch
    # module: nn.Parameter(torch.tensor([1.0])). forward() takes no inputs.
    _ = jax.random.PRNGKey(0)  # unused; kept for deterministic-setup parity
    x_param = jnp.array([1.0], dtype=jnp.float32)

    result = quadratic_forward(x_param)
    jax.block_until_ready(result)

    expected = -(x_param ** 2)
    assert result.shape == (1,), result.shape
    assert jnp.allclose(result, expected), (result, expected)

    # Gradient check through the custom_vjp path: d/dx(-x^2) = -2x.
    grad = jax.grad(lambda p: quadratic_forward(p)[0])(x_param)
    jax.block_until_ready(grad)
    assert jnp.allclose(grad, -2.0 * x_param), grad

    print("KERNEL_OK")
</pallas_src>

<mosaic_0001>
module attributes {stable_mosaic.version = 11 : i64} {
  func.func @_neg_square_kernel(%arg0: memref<1xf32, #tpu.memory_space<smem>>, %arg1: memref<1xf32, #tpu.memory_space<smem>>) attributes {dimension_semantics = [], scalar_prefetch = 0 : i64, scratch_operands = 0 : i64, tpu.core_type = #tpu.core_type<tc>} {
    %c0 = arith.constant 0 : index
    %0 = memref.load %arg0[%c0] : memref<1xf32, #tpu.memory_space<smem>>
    %1 = arith.mulf %0, %0 : f32
    %cst = arith.constant 0.000000e+00 : f32
    %2 = arith.subf %cst, %1 : f32
    %c0_0 = arith.constant 0 : index
    %3 = memref.load %arg1[%c0_0] : memref<1xf32, #tpu.memory_space<smem>>
    memref.store %2, %arg1[%c0_0] : memref<1xf32, #tpu.memory_space<smem>>
    return
  }
}

</mosaic_0001>

<bundles_post_ra>
// kernel: tpu_custom_call.1
= control target key start
LH: loop header
LB: loop body
LE: loop exit
PB: predicated region body
PF: predicated region fallthrough
CT: control target
= control target key end

     0   :  { %7 = vsyncpa [#allocation4], 0  ;;  %s39_s10 = smov [#allocation3]   ;;  %s57_s0 = inlined_call_operand.<no memory space> [shape: f32[1], index: 0, kind: input, shape index: {}]   ;;  %s58_s1 = inlined_call_operand.hbm [shape: f32[1], index: 1, kind: output, shape index: {}]  }
   0x1   :  { %s11_s8 = smul.f32 %s57_s0, %s57_s0 }
   0x3   :  { %s12_s9 = ssub.f32 0.0, %s11_s8 }
   0x5   :  { %14 = sst [smem:[#allocation3]] %s12_s9 }
   0x6   :  { %22 = dma.smem_to_hbm %s39_s10, 16, %s58_s1, [#allocation4]  }
   0x7   :  { %37 = dma.done.wait [#allocation4], 16  }
   0x8   :  { %38 = vsyncadd [#allocation4], 4294967280 }
   0x9   :  { %26 = sfence }
   0xa   :  { %27 = vsyncpa [#allocation4], 1 }

</bundles_post_ra>
